<compile_context>
chip_gen: v5e
topology: v5e:2x2
jax: 0.10.0
libtpu: 0.0.40
codegen_flags: <defaults>
</compile_context>

<pallas_src>
import jax
import jax.numpy as jnp
from jax.experimental import pallas as pl
from jax.experimental.pallas import tpu as pltpu

IN_FEATURES = 17


def _round_up(n: int, m: int) -> int:
    return ((n + m - 1) // m) * m


def _mlp_kernel(xT_ref, w1_ref, b1_ref, w2_ref, b2_ref, o_ref):
    # Layer 1 (transposed layout, batch on lanes):
    #   (H, 17) @ (17, TB) -> (H, TB) on the MXU, f32 accumulation.
    h = jnp.dot(w1_ref[...], xT_ref[...], preferred_element_type=jnp.float32)
    # Bias add + ReLU on the VPU; b1 is (H, 1) and broadcasts across lanes.
    h = jnp.maximum(h + b1_ref[...], 0.0)
    # Layer 2 has N == 1: skip the MXU. VPU multiply by the (H, 1) weight
    # column, then a sublane (XLU) reduce over H -> lane-dense (1, TB).
    z = jnp.sum(h * w2_ref[...], axis=0, keepdims=True) + b2_ref[0, 0]
    # Sigmoid (EUP exp + VPU).
    o_ref[...] = jax.nn.sigmoid(z)


def netmonk_forward(x, w1, b1, w2, b2, *, tb=None):
    """Fused NetMonkRegressor forward.

    x:  (B, 17) f32
    w1: (H, 17) f32   (PyTorch layer1.weight layout)
    b1: (H, 1)  f32
    w2: (H, 1)  f32   (layer2.weight transposed to a column)
    b2: (1, 1)  f32
    returns: (B, 1) f32
    """
    B = x.shape[0]
    H = w1.shape[0]

    if tb is None:
        # Large tiles amortize the ~0.35us per-grid-step overhead; the x tile
        # is only tb*17*4 bytes, so even double-buffered this fits comfortably
        # inside v5e's 16 MiB scoped VMEM default (and v7x's 32 MiB).
        tb = max(128, min(2048, _round_up(B, 128)))
    b_pad = _round_up(B, tb)

    # Batch on lanes: transpose to (17, B_pad), zero-pad the batch tail.
    xT = jnp.pad(x.astype(jnp.float32).T, ((0, 0), (0, b_pad - B)))

    grid = (b_pad // tb,)

    flops = 2 * b_pad * IN_FEATURES * H + 3 * b_pad * H + 2 * b_pad
    bytes_accessed = (
        xT.size * 4 + b_pad * 4 + w1.size * 4 + b1.size * 4 + w2.size * 4 + 4
    )

    out = pl.pallas_call(
        _mlp_kernel,
        out_shape=jax.ShapeDtypeStruct((1, b_pad), jnp.float32),
        grid=grid,
        in_specs=[
            # x tile (17, TB): batch dimension tiled over the grid -> pipelined.
            pl.BlockSpec((IN_FEATURES, tb), lambda i: (0, i)),
            # Weights / layer-1 bias pinned to block (0, 0): fetched once,
            # VMEM-resident for all grid steps.
            pl.BlockSpec((H, IN_FEATURES), lambda i: (0, 0)),
            pl.BlockSpec((H, 1), lambda i: (0, 0)),
            pl.BlockSpec((H, 1), lambda i: (0, 0)),
            # b2 is a single scalar: keep it in SMEM, read as b2_ref[0, 0].
            pl.BlockSpec(memory_space=pltpu.MemorySpace.SMEM),
        ],
        # Lane-dense output tile (1, TB), TB a multiple of 128.
        out_specs=pl.BlockSpec((1, tb), lambda i: (0, i)),
        compiler_params=pltpu.CompilerParams(
            # Batch tiles are independent -> shard across both TCs on v7x.
            dimension_semantics=("parallel",),
        ),
        cost_estimate=pl.CostEstimate(
            flops=flops,
            transcendentals=b_pad,  # one exp per output element (sigmoid)
            bytes_accessed=bytes_accessed,
        ),
    )(xT, w1, b1, w2, b2)

    # Back to the PyTorch output shape (B, 1), dropping batch padding.
    return out[0, :B].reshape(B, 1)


def init_params(key, interval: float, hidden_size: int):
    """Mirror the PyTorch init: uniform(-interval, interval) weights, zero
    biases. Stored in the kernel's preferred layouts."""
    k1, k2 = jax.random.split(key)
    w1 = jax.random.uniform(  # layer1.weight: (H, 17)
        k1, (hidden_size, IN_FEATURES), jnp.float32,
        minval=-interval, maxval=interval)
    b1 = jnp.zeros((hidden_size, 1), jnp.float32)          # layer1.bias column
    w2 = jax.random.uniform(  # layer2.weight (1, H) stored transposed: (H, 1)
        k2, (hidden_size, 1), jnp.float32,
        minval=-interval, maxval=interval)
    b2 = jnp.zeros((1, 1), jnp.float32)                     # layer2.bias
    return w1, b1, w2, b2


def reference_forward(x, w1, b1, w2, b2):
    h = jnp.maximum(x @ w1.T + b1.T, 0.0)      # (B, H)
    return jax.nn.sigmoid(h @ w2 + b2)          # (B, 1)


if __name__ == "__main__":
    interval = 0.5
    hidden_size = 32
    batch = 8

    key = jax.random.PRNGKey(0)
    kx, kp, kx2 = jax.random.split(key, 3)
    x = jax.random.normal(kx, (batch, IN_FEATURES), jnp.float32)
    w1, b1, w2, b2 = init_params(kp, interval, hidden_size)

    out = netmonk_forward(x, w1, b1, w2, b2)
    out = jax.block_until_ready(out)

    ref = reference_forward(x, w1, b1, w2, b2)
    assert out.shape == (batch, 1)
    assert jnp.allclose(out, ref, atol=1e-5, rtol=1e-5)

    # Second check: multi-tile grid + batch padding path (B not divisible by
    # the tile size), exercising the pipelined grid loop.
    batch2 = 300
    x2 = jax.random.normal(kx2, (batch2, IN_FEATURES), jnp.float32)
    out2 = jax.block_until_ready(netmonk_forward(x2, w1, b1, w2, b2, tb=128))
    ref2 = reference_forward(x2, w1, b1, w2, b2)
    assert out2.shape == (batch2, 1)
    assert jnp.allclose(out2, ref2, atol=1e-5, rtol=1e-5)

    print("KERNEL_OK")
</pallas_src>

<mosaic_0001>
module attributes {stable_mosaic.version = 11 : i64} {
  func.func @_mlp_kernel(%arg0: i32, %arg1: memref<17x128xf32, #tpu.memory_space<vmem>>, %arg2: memref<32x17xf32, #tpu.memory_space<vmem>>, %arg3: memref<32x1xf32, #tpu.memory_space<vmem>>, %arg4: memref<32x1xf32, #tpu.memory_space<vmem>>, %arg5: memref<1x1xf32, #tpu.memory_space<smem>>, %arg6: memref<1x128xf32, #tpu.memory_space<vmem>>) attributes {dimension_semantics = [#tpu.dimension_semantics<parallel>], iteration_bounds = array<i64: 1>, scalar_prefetch = 0 : i64, scratch_operands = 0 : i64, tpu.core_type = #tpu.core_type<tc>, window_params = [{transform_indices = @transform_0, window_bounds = array<i64: 17, 128>}, {pipeline_mode = #tpu.pipeline_mode<synchronous>, transform_indices = @transform_1, window_bounds = array<i64: 32, 17>}, {pipeline_mode = #tpu.pipeline_mode<synchronous>, transform_indices = @transform_2, window_bounds = array<i64: 32, 1>}, {pipeline_mode = #tpu.pipeline_mode<synchronous>, transform_indices = @transform_3, window_bounds = array<i64: 32, 1>}, {transform_indices = @transform_4, window_bounds = array<i64: 1, 1>}, {transform_indices = @transform_5, window_bounds = array<i64: 1, 128>}]} {
    %c0 = arith.constant 0 : index
    %c0_0 = arith.constant 0 : index
    %0 = vector.load %arg2[%c0, %c0_0] : memref<32x17xf32, #tpu.memory_space<vmem>>, vector<32x17xf32>
    %c0_1 = arith.constant 0 : index
    %c0_2 = arith.constant 0 : index
    %1 = vector.load %arg1[%c0_1, %c0_2] : memref<17x128xf32, #tpu.memory_space<vmem>>, vector<17x128xf32>
    %cst = arith.constant dense<0.000000e+00> : vector<32x128xf32>
    %2 = tpu.matmul %0, %1, %cst {dimension_numbers = #tpu.dot_dimension_numbers<[1], [0], [0], [1], [0, 0, 1, 1], [], []>} : vector<32x17xf32>, vector<17x128xf32>, vector<32x128xf32> -> vector<32x128xf32>
    %c0_3 = arith.constant 0 : index
    %c0_4 = arith.constant 0 : index
    %3 = vector.load %arg3[%c0_3, %c0_4] : memref<32x1xf32, #tpu.memory_space<vmem>>, vector<32x1xf32>
    %4 = vector.broadcast %3 : vector<32x1xf32> to vector<32x128xf32>
    %5 = arith.addf %2, %4 : vector<32x128xf32>
    %cst_5 = arith.constant 0.000000e+00 : f32
    %6 = vector.broadcast %cst_5 : f32 to vector<32x128xf32>
    %7 = arith.maximumf %5, %6 : vector<32x128xf32>
    %c0_6 = arith.constant 0 : index
    %c0_7 = arith.constant 0 : index
    %8 = vector.load %arg4[%c0_6, %c0_7] : memref<32x1xf32, #tpu.memory_space<vmem>>, vector<32x1xf32>
    %9 = vector.broadcast %8 : vector<32x1xf32> to vector<32x128xf32>
    %10 = arith.mulf %7, %9 : vector<32x128xf32>
    %cst_8 = arith.constant dense<0.000000e+00> : vector<128xf32>
    %11 = vector.multi_reduction <add>, %10, %cst_8 [0] : vector<32x128xf32> to vector<128xf32>
    %12 = vector.shape_cast %11 : vector<128xf32> to vector<1x128xf32>
    %c0_9 = arith.constant 0 : index
    %c0_10 = arith.constant 0 : index
    %13 = memref.load %arg5[%c0_9, %c0_10] : memref<1x1xf32, #tpu.memory_space<smem>>
    %14 = vector.broadcast %13 : f32 to vector<1x128xf32>
    %15 = arith.addf %12, %14 : vector<1x128xf32>
    %16 = arith.negf %15 : vector<1x128xf32>
    %17 = math.exp %16 : vector<1x128xf32>
    %cst_11 = arith.constant 1.000000e+00 : f32
    %18 = vector.broadcast %cst_11 : f32 to vector<1x128xf32>
    %19 = arith.addf %18, %17 : vector<1x128xf32>
    %20 = arith.divf %18, %19 : vector<1x128xf32>
    %c0_12 = arith.constant 0 : index
    %c0_13 = arith.constant 0 : index
    %21 = vector.load %arg6[%c0_12, %c0_13] : memref<1x128xf32, #tpu.memory_space<vmem>>, vector<1x128xf32>
    tpu.vector_store %arg6[%c0_12, %c0_13], %20 {strides = array<i32>} : memref<1x128xf32, #tpu.memory_space<vmem>>, vector<1x128xf32>,
    return
  }
  func.func @transform_0(%arg0: i32) -> (i32, i32) {
    %c0_i32 = arith.constant 0 : i32
    %c0_i32_0 = arith.constant 0 : i32
    return %c0_i32, %arg0 : i32, i32
  }
  func.func @transform_1(%arg0: i32) -> (i32, i32) {
    %c0_i32 = arith.constant 0 : i32
    %c0_i32_0 = arith.constant 0 : i32
    %c0_i32_1 = arith.constant 0 : i32
    return %c0_i32, %c0_i32_0 : i32, i32
  }
  func.func @transform_2(%arg0: i32) -> (i32, i32) {
    %c0_i32 = arith.constant 0 : i32
    %c0_i32_0 = arith.constant 0 : i32
    %c0_i32_1 = arith.constant 0 : i32
    return %c0_i32, %c0_i32_0 : i32, i32
  }
  func.func @transform_3(%arg0: i32) -> (i32, i32) {
    %c0_i32 = arith.constant 0 : i32
    %c0_i32_0 = arith.constant 0 : i32
    %c0_i32_1 = arith.constant 0 : i32
    return %c0_i32, %c0_i32_0 : i32, i32
  }
  func.func @transform_4(%arg0: i32) -> (i32, i32) {
    %c0_i32 = arith.constant 0 : i32
    %c0_i32_0 = arith.constant 0 : i32
    %c0_i32_1 = arith.constant 0 : i32
    return %c0_i32, %c0_i32_0 : i32, i32
  }
  func.func @transform_5(%arg0: i32) -> (i32, i32) {
    %c0_i32 = arith.constant 0 : i32
    %c0_i32_0 = arith.constant 0 : i32
    return %c0_i32, %arg0 : i32, i32
  }
}

</mosaic_0001>

<bundles_post_ra>
// kernel: tpu_custom_call.1
= control target key start
LH: loop header
LB: loop body
LE: loop exit
PB: predicated region body
PF: predicated region fallthrough
CT: control target
= control target key end

     0   :  { %vm66_vm0 = vcmask 1040384   ;;  %v229_v1 = vmov 0   ;;  %s312_s0 = inlined_call_operand.vmem [shape: f32[17,128], index: 0, kind: input, shape index: {}]   ;;  %s313_s1 = inlined_call_operand.vmem [shape: f32[32,17], index: 1, kind: input, shape index: {}]   ;;  %s314_s2 = inlined_call_operand.vmem [shape: f32[32,1], index: 2, kind: input, shape index: {}]   ;;  %s315_s3 = inlined_call_operand.vmem [shape: f32[32,1], index: 3, kind: input, shape index: {}]   ;;  %s316_s4 = inlined_call_operand.<no memory space> [shape: f32[1,1], index: 4, kind: input, shape index: {}]   ;;  %s317_s5 = inlined_call_operand.hbm [shape: f32[1,128], index: 5, kind: output, shape index: {}]  }
   0x1   :  { %v28_v0 = vld [vmem:[%s312_s0 + $0x10] sm:$0x1]  ;;  %197 = vset.pattern.permute.xlu1 %v229_v1  ;;  %196 = vset.pattern.permute.xlu0 %v229_v1  ;;  %v29_v3 = vld [vmem:[%s314_s2] sm:$0xff]  ;;  %v27_v4 = vld [vmem:[%s312_s0 + $0x8] sm:$0xff] }
   0x2   :  { %v31_v2 = vld [vmem:[%s314_s2 + $0x10] sm:$0xff]  ;;  %179 = vmatpush.msk.msra.mxu0 %vm66_vm0, %v28_v0  ;;  %185 = vmatpush.msk.msra.mxu1 %vm66_vm0, %v28_v0  ;;  %v26_v5 = vld [vmem:[%s312_s0] sm:$0xff] }
   0x3   :  { %186 = vmatpush.msk.msra.mxu2 %vm66_vm0, %v28_v0  ;;  %187 = vmatpush.msk.msra.mxu3 %vm66_vm0, %v28_v0 }
   0x4   :  { %45 = vperm.xlu1 %197, %v31_v2   ;;  %35 = vperm.xlu0 %196, %v29_v3  }
   0x5   :  { %84 = vmatpush.msra.mxu0 %v27_v4  ;;  %188 = vmatpush.msra.mxu1 %v27_v4 }
   0x6   :  { %11 = vsyncpa [#allocation4], 0  ;;  %189 = vmatpush.msra.mxu2 %v27_v4  ;;  %190 = vmatpush.msra.mxu3 %v27_v4  ;;  %v22_v6 = vld [vmem:[%s313_s1] sm:$0xff]  ;;  %vm53_vm1 = vcmask 138240   ;;  %v23_v7 = vld [vmem:[%s313_s1 + $0x8] sm:$0xff]  ;;  %v141_v48 = vstv %s316_s4  ;;  %s230_s21 = smov [#allocation3]  }
   0x7   :  { %85 = vmatpush.msra.mxu0 %v26_v5  ;;  %191 = vmatpush.msra.mxu1 %v26_v5  ;;  %v24_v8 = vld [vmem:[%s313_s1 + $0x10] sm:$0xff]  ;;  %v25_v9 = vld [vmem:[%s313_s1 + $0x18] sm:$0xff]  ;;  %v30_v11 = vld [vmem:[%s314_s2 + $0x8] sm:$0xff]  ;;  %s168_s22 = sshll.u32 %s230_s21, 4  ;;  %s170_s4 = sshll.u32 %s317_s5, 4  ;;  %s169_s22 = int_to_ptr.vmem [resolvable:$true] %s168_s22  ;;  %s171_s4 = int_to_ptr.hbm [resolvable:$true] %s170_s4 }
   0x8   :  { %192 = vmatpush.msra.mxu2 %v26_v5  ;;  %193 = vmatpush.msra.mxu3 %v26_v5  ;;  %v32_v10 = vld [vmem:[%s314_s2 + $0x18] sm:$0xff]  ;;  %v103_v12 = vld [vmem:[%s315_s3] sm:$0xff]  ;;  %v105_v14 = vld [vmem:[%s315_s3 + $0x10] sm:$0xff] }
   0x9   :  { %180 = vmatmul.msk.f32.vlgmr.msra.gmra.mxu0 %vm53_vm1, %v22_v6  ;;  %181 = vmatmul.msk.f32.vlgmr.msra.gmra.mxu1 %vm53_vm1, %v23_v7  ;;  %v106_v13 = vld [vmem:[%s315_s3 + $0x18] sm:$0xff]  ;;  %v104_v15 = vld [vmem:[%s315_s3 + $0x8] sm:$0xff] }
   0xa   :  { %182 = vmatmul.msk.f32.vlgmr.msra.gmra.mxu2 %vm53_vm1, %v24_v8  ;;  %183 = vmatmul.msk.f32.vlgmr.msra.gmra.mxu3 %vm53_vm1, %v25_v9 }
   0xb   :  { %198 = vset.pattern.permute.xlu2 %v229_v1 }
   0xc   :  { %50 = vperm.xlu1 %197, %v32_v10   ;;  %40 = vperm.xlu0 %196, %v30_v11  }
   0xd   :  { %109 = vperm.xlu2 %198, %v103_v12  }
  0x14   :  { %124 = vperm.xlu1 %197, %v106_v13   ;;  %119 = vperm.xlu0 %196, %v105_v14  }
  0x15   :  { %114 = vperm.xlu2 %198, %v104_v15  }
  0x67   :  { %v110_v18 = vpop.permute.xlu2 %109 }
  0x6f   :  { %v115_v27 = vpop.permute.xlu2 %114 }
  0x76   :  { %v36_v16 = vpop.permute.xlu0 %35  ;;  %v46_v17 = vpop.permute.xlu1 %45 }
  0x7e   :  { %v41_v19 = vpop.permute.xlu0 %40  ;;  %v51_v24 = vpop.permute.xlu1 %50 }
  0x86   :  { %v87_v20 = vpop.f32.mrf.mxu0  ;;  %v90_v21 = vpop.f32.mrf.mxu1 }
  0x87   :  { %v88_v22 = vadd.f32 %v87_v20, %v36_v16  ;;  %v91_v23 = vadd.f32 %v90_v21, %v41_v19  ;;  %v120_v36 = vpop.permute.xlu0 %119  ;;  %v125_v39 = vpop.permute.xlu1 %124 }
  0x89   :  { %v99_v25 = vmax.f32 %v88_v22, 0.0  ;;  %v100_v26 = vmax.f32 %v91_v23, 0.0 }
  0x8b   :  { %v127_v30 = vmul.f32 %v110_v18, %v99_v25  ;;  %v128_v31 = vmul.f32 %v115_v27, %v100_v26 }
  0x8d   :  { %v93_v28 = vpop.f32.mrf.mxu2  ;;  %v96_v29 = vpop.f32.mrf.mxu3  ;;  %v131_v37 = vadd.f32 %v128_v31, %v127_v30 }
  0x8e   :  { %v94_v32 = vadd.f32 %v93_v28, %v46_v17  ;;  %v97_v33 = vadd.f32 %v96_v29, %v51_v24 }
  0x90   :  { %v101_v34 = vmax.f32 %v94_v32, 0.0  ;;  %v102_v35 = vmax.f32 %v97_v33, 0.0 }
  0x92   :  { %v129_v38 = vmul.f32 %v120_v36, %v101_v34  ;;  %v130_v41 = vmul.f32 %v125_v39, %v102_v35 }
  0x94   :  { %v132_v40 = vadd.f32 %v131_v37, %v129_v38 }
  0x96   :  { %v133_v42 = vadd.f32 %v132_v40, %v130_v41 }
  0x98   :  { %v134_v43 = vrot.slane %v133_v42, 4 }
  0x9a   :  { %v135_v44 = vadd.f32 %v134_v43, %v133_v42 }
  0x9c   :  { %v136_v45 = vrot.slane %v135_v44, 2 }
  0x9e   :  { %v137_v46 = vadd.f32 %v136_v45, %v135_v44 }
  0xa0   :  { %v138_v47 = vrot.slane %v137_v46, 1 }
  0xa2   :  { %v139_v49 = vadd.f32 %v138_v47, %v137_v46 }
  0xa4   :  { %v142_v50 = vadd.f32 %v141_v48, %v139_v49 }
  0xa6   :  { %v184_v51 = vmul.f32 -1.442695, %v142_v50 }
  0xa8   :  { %199 = vpow2.f32 %v184_v51 }
  0xae   :  { %v200_v52 = vpop.eup %199 }
  0xaf   :  { %v146_v53 = vadd.f32 1.0, %v200_v52 }
  0xb1   :  { %201 = vrcp.f32 %v146_v53  ;;  %v158_v57 = vand.u32 2147483648, %v146_v53  ;;  %v156_v59 = vand.u32 2147483647, %v146_v53  ;;  %vm152_vm3 = vweird.f32 %v146_v53 }
  0xb3   :  { %v159_v61 = vor.u32 1.1754944e-38, %v158_v57  ;;  %vm157_vm5 = vcmp.eq.f32.partialorder %v156_v59, 8.507059e+37 }
  0xb7   :  { %v202_v54 = vpop.eup %201 }
  0xb8   :  { %v148_v55 = vmul.f32 %v202_v54, %v146_v53  ;;  %vm153_vm2 = vweird.f32 %v202_v54 }
  0xb9   :  { %vm154_vm4 = vmor %vm152_vm3, %vm153_vm2 }
  0xba   :  { %v149_v56 = vsub.f32 1.0, %v148_v55 }
  0xbc   :  { %v150_v58 = vmul.f32 %v202_v54, %v149_v56 }
  0xbe   :  { %v151_v60 = vadd.f32 %v202_v54, %v150_v58 }
  0xc0   :  { %v155_v62 = vsel %vm154_vm4, %v202_v54, %v151_v60 }
  0xc1   :  { %v160_v63 = vsel %vm157_vm5, %v159_v61, %v155_v62 }
  0xc2   :  { %162 = vst [vmem:[#allocation3] sm:$0x1] %v160_v63 }
  0xc3   :  { %173 = dma.vmem_to_hbm [thread:$0]  %s169_s22, 16, %s171_s4, [#allocation4]  }
  0xc4   :  { %227 = dma.done.wait [#allocation4], 16  }
  0xc5   :  { %228 = vsyncadd [#allocation4], 4294967280 }
  0xc6   :  { %178 = vsyncpa [#allocation4], 1 }

</bundles_post_ra>
